<compile_context>
chip_gen: v7x
topology: tpu7x:2x2x1
jax: 0.10.0
libtpu: 0.0.40
codegen_flags: <defaults>
</compile_context>

<pallas_src>
import jax
import jax.numpy as jnp
from jax import lax
from jax.experimental import pallas as pl
from jax.experimental.pallas import tpu as pltpu

# ---- model dimensions (small, consistent with the module's forward) --------
BATCH = 8
BATCH_MED = 300     # must take the grid-free path (raised threshold)
BATCH_BIG = 5000    # exercises the 2-step "parallel" grid path
OBS_DIM = 16        # observation_space.shape = (16,)
H_IN = 64           # in_block.out_size
H_OUT = 32          # hidden_block.out_size (LayerNorm normalized dim)
LN_EPS = 1e-5

# lane-dense padded widths (128-lane vreg width)
H_IN_PAD = 128
H_OUT_PAD = 128
W_ROWS = OBS_DIM + H_IN_PAD   # 144 rows: w1 in rows [0,16), w2 in rows [16,144)


def _round_up(n, m):
    return ((n + m - 1) // m) * m


def _lifelong_kernel(x_ref, w_ref, p_ref, o_ref):
    # w_ref rows [0:OBS_DIM)   : w1 padded to (OBS_DIM, 128)
    # w_ref rows [OBS_DIM:144) : w2 padded to (128, 128)
    # p_ref rows: 0 = b1 (padded), 1 = b2 (padded), 2 = gamma, 3 = beta.
    # Static, 8-row-aligned slices of the packed weight slab (zero-cost views).
    w1 = w_ref[0:OBS_DIM, :]
    w2 = w_ref[OBS_DIM:W_ROWS, :]

    # in_block: Linear + ReLU (f32 operands for exact parity with torch Linear)
    h = jnp.dot(x_ref[...], w1, preferred_element_type=jnp.float32)
    h = jnp.maximum(h + p_ref[0:1, :], 0.0)

    # hidden_block: Linear + ReLU (pad lanes stay exactly zero)
    h = jnp.dot(h, w2, preferred_element_type=jnp.float32)
    h = jnp.maximum(h + p_ref[1:2, :], 0.0)

    # hidden_normalize: LayerNorm over the first H_OUT lanes only.
    # PyTorch semantics: biased variance, eps inside the sqrt.
    # Mean AND variance are both masked to the valid lanes (the extra vsel is
    # free on the VALU and removes the pad-lanes-are-zero invariant).
    lane = lax.broadcasted_iota(jnp.int32, h.shape, dimension=1)
    valid = lane < H_OUT
    hv = jnp.where(valid, h, 0.0)
    mean = jnp.sum(hv, axis=-1, keepdims=True) * (1.0 / H_OUT)
    centered = jnp.where(valid, h - mean, 0.0)
    var = jnp.sum(centered * centered, axis=-1, keepdims=True) * (1.0 / H_OUT)
    h_norm = centered * lax.rsqrt(var + LN_EPS)

    # pad lanes: h_norm == 0, gamma_pad == 0, beta_pad == 0 -> output pad == 0
    o_ref[...] = (h_norm * p_ref[2:3, :] + p_ref[3:4, :]).astype(o_ref.dtype)


def _pack_params(w1, b1, w2, b2, gamma, beta):
    """Pack both weight matrices into one lane-dense (144, 128) f32 slab and the
    four small vectors into one (4, 128) f32 slab.  Called ONCE at setup."""
    wslab = jnp.zeros((W_ROWS, H_OUT_PAD), jnp.float32)
    wslab = wslab.at[:OBS_DIM, :H_IN].set(w1.astype(jnp.float32))
    wslab = wslab.at[OBS_DIM:OBS_DIM + H_IN, :H_OUT].set(w2.astype(jnp.float32))
    p = jnp.zeros((4, H_OUT_PAD), jnp.float32)
    p = p.at[0, :H_IN].set(b1.reshape(-1).astype(jnp.float32))
    p = p.at[1, :H_OUT].set(b2.reshape(-1).astype(jnp.float32))
    p = p.at[2, :H_OUT].set(gamma.reshape(-1).astype(jnp.float32))
    p = p.at[3, :H_OUT].set(beta.reshape(-1).astype(jnp.float32))
    return wslab, p


def make_lifelong_forward(w1, b1, w2, b2, gamma, beta, *, block_b=4096):
    """Pack parameters once; return a jitted forward(x) -> (B, H_OUT)."""
    wslab, p = _pack_params(w1, b1, w2, b2, gamma, beta)  # packed once, cached

    @jax.jit
    def forward(x):
        B, obs = x.shape
        assert obs == OBS_DIM

        if B <= block_b:
            # --- single-shot kernel: no grid, no pipeline prologue/epilogue ---
            bp = _round_up(max(B, 8), 8)
            xp = x if bp == B else jnp.pad(x, ((0, bp - B), (0, 0)))
            out = pl.pallas_call(
                _lifelong_kernel,
                out_shape=jax.ShapeDtypeStruct((bp, H_OUT_PAD), jnp.float32),
                # explicit VMEM placement for every operand (one DMA each,
                # body runs fully out of VMEM)
                in_specs=[
                    pl.BlockSpec(memory_space=pltpu.MemorySpace.VMEM),
                    pl.BlockSpec(memory_space=pltpu.MemorySpace.VMEM),
                    pl.BlockSpec(memory_space=pltpu.MemorySpace.VMEM),
                ],
                out_specs=pl.BlockSpec(memory_space=pltpu.MemorySpace.VMEM),
            )(xp, wslab, p)
        else:
            # --- batch-tiled path: a SMALL, even number of big row blocks.
            # >=2 steps lets v7x's two TensorCores each take a block
            # ("parallel" axis); on v5e/v6e it is just 2-3 cheap big steps.
            n_blocks = max(2, -(-B // block_b))          # ceil division
            blk = _round_up(-(-B // n_blocks), 8)        # rows per block, 8-aligned
            bp = blk * n_blocks
            xp = x if bp == B else jnp.pad(x, ((0, bp - B), (0, 0)))
            out = pl.pallas_call(
                _lifelong_kernel,
                out_shape=jax.ShapeDtypeStruct((bp, H_OUT_PAD), jnp.float32),
                grid=(n_blocks,),
                in_specs=[
                    pl.BlockSpec((blk, OBS_DIM), lambda i: (i, 0)),
                    # constant index_map -> weights stay VMEM-resident
                    pl.BlockSpec((W_ROWS, H_OUT_PAD), lambda i: (0, 0)),
                    pl.BlockSpec((4, H_OUT_PAD), lambda i: (0, 0)),
                ],
                out_specs=pl.BlockSpec((blk, H_OUT_PAD), lambda i: (i, 0)),
                compiler_params=pltpu.CompilerParams(
                    dimension_semantics=("parallel",),
                    # headroom above v5e's 16 MiB default scoped VMEM so large
                    # (double-buffered) row blocks never hit a compile-time OOM
                    vmem_limit_bytes=64 * 1024 * 1024,
                ),
            )(xp, wslab, p)

        # Padded rows (zeros) pass harmlessly through LayerNorm (var=0, eps>0)
        # and are sliced off here together with the pad lanes.
        return out[:B, :H_OUT]

    return forward


def _reference(x, w1, b1, w2, b2, gamma, beta):
    # Plain f32 math — matches the PyTorch module (f32 Linear + ReLU + LayerNorm).
    h = jnp.maximum(jnp.dot(x, w1) + b1, 0.0)
    h = jnp.maximum(jnp.dot(h, w2) + b2, 0.0)
    mean = jnp.mean(h, axis=-1, keepdims=True)
    var = jnp.mean((h - mean) ** 2, axis=-1, keepdims=True)
    return (h - mean) * lax.rsqrt(var + LN_EPS) * gamma + beta


if __name__ == "__main__":
    key = jax.random.PRNGKey(0)
    k_x, k_w1, k_b1, k_w2, k_b2, k_xm, k_xl = jax.random.split(key, 7)

    # deterministic synthetic parameters (no checkpoint load)
    w1 = jax.random.normal(k_w1, (OBS_DIM, H_IN), dtype=jnp.float32) * 0.1
    b1 = jax.random.normal(k_b1, (H_IN,), dtype=jnp.float32) * 0.01
    w2 = jax.random.normal(k_w2, (H_IN, H_OUT), dtype=jnp.float32) * 0.1
    b2 = jax.random.normal(k_b2, (H_OUT,), dtype=jnp.float32) * 0.01
    gamma = jnp.ones((H_OUT,), dtype=jnp.float32)   # LayerNorm weight init
    beta = jnp.zeros((H_OUT,), dtype=jnp.float32)   # LayerNorm bias init

    forward = make_lifelong_forward(w1, b1, w2, b2, gamma, beta)

    # Path 1: small batch — single-shot (grid-free) kernel.
    x = jax.random.normal(k_x, (BATCH, OBS_DIM), dtype=jnp.float32)
    out = jax.block_until_ready(forward(x))
    ref = _reference(x, w1, b1, w2, b2, gamma, beta)
    assert out.shape == (BATCH, H_OUT)
    assert jnp.allclose(out, ref, atol=1e-3, rtol=1e-3)

    # Path 2: medium batch (300) — still grid-free after raising the threshold.
    xm = jax.random.normal(k_xm, (BATCH_MED, OBS_DIM), dtype=jnp.float32)
    out_m = jax.block_until_ready(forward(xm))
    ref_m = _reference(xm, w1, b1, w2, b2, gamma, beta)
    assert out_m.shape == (BATCH_MED, H_OUT)
    assert jnp.allclose(out_m, ref_m, atol=1e-3, rtol=1e-3)

    # Path 3: large batch — 2-step "parallel" grid, VMEM-resident weights.
    xl = jax.random.normal(k_xl, (BATCH_BIG, OBS_DIM), dtype=jnp.float32)
    out_l = jax.block_until_ready(forward(xl))
    ref_l = _reference(xl, w1, b1, w2, b2, gamma, beta)
    assert out_l.shape == (BATCH_BIG, H_OUT)
    assert jnp.allclose(out_l, ref_l, atol=1e-3, rtol=1e-3)

    print("KERNEL_OK")
</pallas_src>

<mosaic_0001>
module attributes {stable_mosaic.version = 11 : i64} {
  func.func @_lifelong_kernel(%arg0: memref<8x16xf32, #tpu.memory_space<vmem>>, %arg1: memref<144x128xf32, #tpu.memory_space<vmem>>, %arg2: memref<4x128xf32, #tpu.memory_space<vmem>>, %arg3: memref<8x128xf32, #tpu.memory_space<vmem>>) attributes {dimension_semantics = [], scalar_prefetch = 0 : i64, scratch_operands = 0 : i64, tpu.core_type = #tpu.core_type<tc>} {
    %c0 = arith.constant 0 : index
    %c0_0 = arith.constant 0 : index
    %0 = vector.load %arg1[%c0, %c0_0] : memref<144x128xf32, #tpu.memory_space<vmem>>, vector<16x128xf32>
    %c16 = arith.constant 16 : index
    %c0_1 = arith.constant 0 : index
    %1 = vector.load %arg1[%c16, %c0_1] : memref<144x128xf32, #tpu.memory_space<vmem>>, vector<128x128xf32>
    %c0_2 = arith.constant 0 : index
    %c0_3 = arith.constant 0 : index
    %2 = vector.load %arg0[%c0_2, %c0_3] : memref<8x16xf32, #tpu.memory_space<vmem>>, vector<8x16xf32>
    %cst = arith.constant dense<0.000000e+00> : vector<8x128xf32>
    %3 = tpu.matmul %2, %0, %cst {dimension_numbers = #tpu.dot_dimension_numbers<[1], [0], [0], [1], [0, 0, 1, 1], [], []>} : vector<8x16xf32>, vector<16x128xf32>, vector<8x128xf32> -> vector<8x128xf32>
    %c0_4 = arith.constant 0 : index
    %c0_5 = arith.constant 0 : index
    %4 = vector.load %arg2[%c0_4, %c0_5] : memref<4x128xf32, #tpu.memory_space<vmem>>, vector<1x128xf32>
    %5 = vector.broadcast %4 : vector<1x128xf32> to vector<8x128xf32>
    %6 = arith.addf %3, %5 : vector<8x128xf32>
    %cst_6 = arith.constant 0.000000e+00 : f32
    %7 = vector.broadcast %cst_6 : f32 to vector<8x128xf32>
    %8 = arith.maximumf %6, %7 : vector<8x128xf32>
    %cst_7 = arith.constant dense<0.000000e+00> : vector<8x128xf32>
    %9 = tpu.matmul %8, %1, %cst_7 {dimension_numbers = #tpu.dot_dimension_numbers<[1], [0], [0], [1], [0, 0, 1, 1], [], []>} : vector<8x128xf32>, vector<128x128xf32>, vector<8x128xf32> -> vector<8x128xf32>
    %c1 = arith.constant 1 : index
    %c0_8 = arith.constant 0 : index
    %10 = vector.load %arg2[%c1, %c0_8] : memref<4x128xf32, #tpu.memory_space<vmem>>, vector<1x128xf32>
    %11 = vector.broadcast %10 : vector<1x128xf32> to vector<8x128xf32>
    %12 = arith.addf %9, %11 : vector<8x128xf32>
    %cst_9 = arith.constant 0.000000e+00 : f32
    %13 = vector.broadcast %cst_9 : f32 to vector<8x128xf32>
    %14 = arith.maximumf %12, %13 : vector<8x128xf32>
    %15 = tpu.iota {dimensions = array<i32: 1>} : vector<8x128xi32>
    %c32_i32 = arith.constant 32 : i32
    %16 = vector.broadcast %c32_i32 : i32 to vector<8x128xi32>
    %17 = arith.cmpi slt, %15, %16 : vector<8x128xi32>
    %cst_10 = arith.constant 0.000000e+00 : f32
    %18 = vector.broadcast %cst_10 : f32 to vector<8x128xf32>
    %19 = arith.select %17, %14, %18 : vector<8x128xi1>, vector<8x128xf32>
    %cst_11 = arith.constant dense<0.000000e+00> : vector<8xf32>
    %20 = vector.multi_reduction <add>, %19, %cst_11 [1] : vector<8x128xf32> to vector<8xf32>
    %21 = vector.shape_cast %20 : vector<8xf32> to vector<8x1xf32>
    %cst_12 = arith.constant 3.125000e-02 : f32
    %22 = vector.broadcast %cst_12 : f32 to vector<8x1xf32>
    %23 = arith.mulf %21, %22 : vector<8x1xf32>
    %24 = vector.broadcast %23 : vector<8x1xf32> to vector<8x128xf32>
    %25 = arith.subf %14, %24 : vector<8x128xf32>
    %cst_13 = arith.constant 0.000000e+00 : f32
    %26 = vector.broadcast %cst_13 : f32 to vector<8x128xf32>
    %27 = arith.select %17, %25, %26 : vector<8x128xi1>, vector<8x128xf32>
    %28 = arith.mulf %27, %27 : vector<8x128xf32>
    %cst_14 = arith.constant dense<0.000000e+00> : vector<8xf32>
    %29 = vector.multi_reduction <add>, %28, %cst_14 [1] : vector<8x128xf32> to vector<8xf32>
    %30 = vector.shape_cast %29 : vector<8xf32> to vector<8x1xf32>
    %cst_15 = arith.constant 3.125000e-02 : f32
    %31 = vector.broadcast %cst_15 : f32 to vector<8x1xf32>
    %32 = arith.mulf %30, %31 : vector<8x1xf32>
    %cst_16 = arith.constant 9.99999974E-6 : f32
    %33 = vector.broadcast %cst_16 : f32 to vector<8x1xf32>
    %34 = arith.addf %32, %33 : vector<8x1xf32>
    %35 = math.rsqrt %34 : vector<8x1xf32>
    %36 = vector.broadcast %35 : vector<8x1xf32> to vector<8x128xf32>
    %37 = arith.mulf %27, %36 : vector<8x128xf32>
    %c2 = arith.constant 2 : index
    %c0_17 = arith.constant 0 : index
    %38 = vector.load %arg2[%c2, %c0_17] : memref<4x128xf32, #tpu.memory_space<vmem>>, vector<1x128xf32>
    %39 = vector.broadcast %38 : vector<1x128xf32> to vector<8x128xf32>
    %40 = arith.mulf %37, %39 : vector<8x128xf32>
    %c3 = arith.constant 3 : index
    %c0_18 = arith.constant 0 : index
    %41 = vector.load %arg2[%c3, %c0_18] : memref<4x128xf32, #tpu.memory_space<vmem>>, vector<1x128xf32>
    %42 = vector.broadcast %41 : vector<1x128xf32> to vector<8x128xf32>
    %43 = arith.addf %40, %42 : vector<8x128xf32>
    %c0_19 = arith.constant 0 : index
    %c0_20 = arith.constant 0 : index
    %44 = vector.load %arg3[%c0_19, %c0_20] : memref<8x128xf32, #tpu.memory_space<vmem>>, vector<8x128xf32>
    tpu.vector_store %arg3[%c0_19, %c0_20], %43 {strides = array<i32>} : memref<8x128xf32, #tpu.memory_space<vmem>>, vector<8x128xf32>,
    return
  }
}

</mosaic_0001>

<bundles_post_ra>
// kernel: forward.1
= control target key start
LH: loop header
LB: loop body
LE: loop exit
PB: predicated region body
PF: predicated region fallthrough
CT: control target
= control target key end

     0   :  { %8 = vsyncpa [#allocation3], 0  ;;  %s520_s0 = inlined_call_operand.hbm [shape: f32[8,16], index: 0, kind: input, shape index: {}]   ;;  %s521_s1 = inlined_call_operand.hbm [shape: f32[144,128], index: 1, kind: input, shape index: {}]   ;;  %s522_s2 = inlined_call_operand.vmem [shape: f32[4,128], index: 2, kind: input, shape index: {}]   ;;  %s523_s3 = inlined_call_operand.hbm [shape: f32[8,128], index: 3, kind: output, shape index: {}]  }
   0x1   :  { %9 = vsyncpa [#allocation6], 0 }
   0x2   :  { %10 = vsyncpa [#allocation4], 0  ;;  %s437_s12 = smov [#allocation2]   ;;  %s438_s14 = smov [#allocation5]  }
   0x3   :  { %s17_s13 = sshll.u32 %s437_s12, 4  ;;  %s26_s15 = sshll.u32 %s438_s14, 4  ;;  %s18_s13 = int_to_ptr.vmem [resolvable:$true] %s17_s13  ;;  %s465_s15 = int_to_ptr.vmem [resolvable:$true] %s26_s15 }
   0x4   :  { %s365_s18 = scalar_lea.hbm %s520_s0, 128 }
   0x5   :  { %p366_p0 = scmp.ne.s32.totalorder %s520_s0, %s365_s18  ;;  %p369_p1 = scmp.lt.u32.totalorder %s365_s18, %s520_s0 }
   0x7   :  { %p371_p2 = pnand %p369_p1, %p366_p0 }
   0x9   :  { %374 = shalt.err (!%p371_p2)
}
   0xa   :  { %s375_s23 = scalar_lea.vmem %s18_s13, 128  ;;  %p380_p4 = scmp.lt.s32.totalorder %s18_s13, %s18_s13 }
   0xb   :  { %p376_p3 = scmp.ne.s32.totalorder %s18_s13, %s375_s23  ;;  %p381_p5 = scmp.lt.s32.totalorder %s375_s23, %s375_s23 }
   0xd   :  { %p382_p6 = por %p381_p5, %p380_p4 }
   0xf   :  { %p383_p7 = pnand %p382_p6, %p376_p3 }
  0x11   :  { %386 = shalt.err (!%p383_p7)
}
  0x12   :  { %20 = dma.hbm_to_vmem [thread:$0]  %s520_s0, 128, %s18_s13, [#allocation3]  }
  0x13   :  { %s387_s28 = scalar_lea.hbm %s521_s1, 2304 }
  0x14   :  { %p388_p8 = scmp.ne.s32.totalorder %s521_s1, %s387_s28  ;;  %p391_p9 = scmp.lt.u32.totalorder %s387_s28, %s521_s1 }
  0x16   :  { %p393_p10 = pnand %p391_p9, %p388_p8 }
  0x18   :  { %396 = shalt.err (!%p393_p10)
}
  0x19   :  { %s397_s6 = scalar_lea.vmem %s465_s15, 2304  ;;  %p402_p12 = scmp.lt.s32.totalorder %s465_s15, %s465_s15 }
  0x1a   :  { %p398_p11 = scmp.ne.s32.totalorder %s465_s15, %s397_s6  ;;  %p403_p13 = scmp.lt.s32.totalorder %s397_s6, %s397_s6 }
  0x1c   :  { %p404_p0 = por %p403_p13, %p402_p12 }
  0x1e   :  { %p405_p1 = pnand %p404_p0, %p398_p11 }
  0x20   :  { %408 = shalt.err (!%p405_p1)
}
  0x21   :  { %s439_s0 = smov 128   ;;  %s440_s7 = smov 8  }
  0x22   :  { %32 = dma.hbm_to_vmem [thread:$0]  %s521_s1, 2304, %s465_s15, [#allocation6], %s439_s0, %s439_s0, %s440_s7  }
  0x23   :  { %431 = dma.done.wait [#allocation3], 128  }
  0x24   :  { %432 = vsyncadd [#allocation3], 4294967168 }
  0x25   :  { %433 = dma.done.wait [#allocation6], 2304  }
  0x26   :  { %434 = vsyncadd [#allocation6], 4294964992  ;;  %v441_v0 = vmov 0.0|0.0   ;;  %vm442_vm0 = vmmov 0   ;;  %v443_v1 = vmov 0.0   ;;  %v41_v2 = vld [vmem:[#allocation5] sm:$0xff]  ;;  %v216_v35 = vlaneseq }
  0x27   :  { %328 = vmatprep.subr.bf16.mxu0 %v441_v0  ;;  %290 = vmatprep.mubr.msk.f32.mxu0 %vm442_vm0, %v443_v1  ;;  %v42_v3 = vld [vmem:[#allocation5 + $0x8] sm:$0xff]  ;;  %v43_v5 = vld [vmem:[#allocation5 + $0x10] sm:$0xff]  ;;  %v44_v6 = vld [vmem:[#allocation5 + $0x18] sm:$0xff]  ;;  %vm65_vm1 = vcmask 130048   ;;  %s444_s17 = smov [#allocation7]  }
  0x28   :  { %331 = vmatprep.subr.bf16.mxu1 %v441_v0  ;;  %325 = vmatprep.mubr.msk.f32.mxu1 %vm442_vm0, %v443_v1  ;;  %v329_v4 = vpack.c.bf16 %v42_v3, %v41_v2  ;;  %v45_v7 = vld [vmem:[#allocation5 + $0x20] sm:$0xff]  ;;  %v332_v8 = vpack.c.bf16 %v44_v6, %v43_v5  ;;  %v46_v9 = vld [vmem:[#allocation5 + $0x28] sm:$0xff]  ;;  %v59_v10 = vld [vmem:[#allocation2] sm:$0xff]  ;;  %v217_v37 = vand.u32 127, %v216_v35  ;;  %s251_s18 = sshll.u32 %s444_s17, 4  ;;  %s252_s18 = int_to_ptr.vmem [resolvable:$true] %s251_s18 }
  0x29   :  { %v335_v11 = vpack.c.bf16 %v46_v9, %v45_v7  ;;  %v47_v12 = vld [vmem:[#allocation5 + $0x30] sm:$0xff]  ;;  %v48_v13 = vld [vmem:[#allocation5 + $0x38] sm:$0xff]  ;;  %v49_v15 = vld [vmem:[#allocation5 + $0x40] sm:$0xff]  ;;  %s409_s19 = scalar_lea.vmem %s252_s18, 128  ;;  %p414_p3 = scmp.lt.s32.totalorder %s252_s18, %s252_s18 }
  0x2a   :  { %330 = vmatpush3.bf16.msra.mxu0 %v329_v4  ;;  %333 = vmatpush3.bf16.msra.mxu1 %v332_v8  ;;  %v338_v14 = vpack.c.bf16 %v48_v13, %v47_v12  ;;  %v50_v16 = vld [vmem:[#allocation5 + $0x48] sm:$0xff]  ;;  %v51_v18 = vld [vmem:[#allocation5 + $0x50] sm:$0xff]  ;;  %v52_v19 = vld [vmem:[#allocation5 + $0x58] sm:$0xff]  ;;  %vm218_vm2 = vcmp.lt.s32.totalorder %v217_v37, 32  ;;  %p410_p2 = scmp.ne.s32.totalorder %s252_s18, %s409_s19  ;;  %p415_p4 = scmp.lt.s32.totalorder %s409_s19, %s409_s19 }
  0x2b   :  { %334 = vmatprep.subr.bf16.mxu1 %v441_v0  ;;  %v341_v17 = vpack.c.bf16 %v50_v16, %v49_v15  ;;  %v344_v20 = vpack.c.bf16 %v52_v19, %v51_v18  ;;  %v53_v21 = vld [vmem:[#allocation5 + $0x60] sm:$0xff]  ;;  %v54_v22 = vld [vmem:[#allocation5 + $0x68] sm:$0xff]  ;;  %v55_v24 = vld [vmem:[#allocation5 + $0x70] sm:$0xff] }
  0x2c   :  { %v347_v23 = vpack.c.bf16 %v54_v22, %v53_v21  ;;  %v56_v25 = vld [vmem:[#allocation5 + $0x78] sm:$0xff]  ;;  %v57_v27 = vld [vmem:[#allocation5 + $0x80] sm:$0xff]  ;;  %v58_v28 = vld [vmem:[#allocation5 + $0x88] sm:$0xff]  ;;  %p416_p5 = por %p415_p4, %p414_p3 }
  0x2d   :  { %291 = vmatmul.mubr.msk.f32.vlgmr.msra.gmra.mrb[0].mxu0 %vm65_vm1, %v59_v10  ;;  %v350_v26 = vpack.c.bf16 %v56_v25, %v55_v24  ;;  %v353_v29 = vpack.c.bf16 %v58_v28, %v57_v27  ;;  %v261_v30 = vld [vmem:[%s522_s2] ss:$0 sm:$0xff]  ;;  %v263_v36 = vld [vmem:[%s522_s2 + $0x1] ss:$0 sm:$0xff]  ;;  %v264_v52 = vld [vmem:[%s522_s2 + $0x2] ss:$0 sm:$0xff] }
  0x2e   :  { %336 = vmatpush3.bf16.msra.mxu1 %v335_v11  ;;  %v265_v54 = vld [vmem:[%s522_s2 + $0x3] ss:$0 sm:$0xff]  ;;  %p417_p6 = pnand %p416_p5, %p410_p2 }
  0x2f   :  { %337 = vmatprep.subr.bf16.mxu1 %v441_v0 }
  0x32   :  { %339 = vmatpush3.bf16.msra.mxu1 %v338_v14 }
  0x33   :  { %340 = vmatprep.subr.bf16.mxu1 %v441_v0 }
  0x36   :  { %342 = vmatpush3.bf16.msra.mxu1 %v341_v17 }
  0x37   :  { %343 = vmatprep.subr.bf16.mxu1 %v441_v0 }
  0x3a   :  { %345 = vmatpush3.bf16.msra.mxu1 %v344_v20 }
  0x3b   :  { %346 = vmatprep.subr.bf16.mxu1 %v441_v0 }
  0x3e   :  { %348 = vmatpush3.bf16.msra.mxu1 %v347_v23 }
  0x3f   :  { %349 = vmatprep.subr.bf16.mxu1 %v441_v0 }
  0x42   :  { %351 = vmatpush3.bf16.msra.mxu1 %v350_v26 }
  0x43   :  { %352 = vmatprep.subr.bf16.mxu1 %v441_v0 }
  0x46   :  { %354 = vmatpush3.bf16.msra.mxu1 %v353_v29 }
 0x100   :  { %v135_v31 = vpop.f32.mrb[0].mxu0 }
 0x101   :  { %v136_v32 = vadd.f32 %v261_v30, %v135_v31  ;;  %v292_v33 = vpop.f32.mrb[1].mxu0 }
 0x103   :  { %v139_v34 = vmax.f32 %v136_v32, 0.0 }
 0x105   :  { %326 = vmatmul.mubr.f32.vlgmr.msra.gmra.mrb[0].mxu1 %v139_v34 }
 0x1d8   :  { %v211_v38 = vpop.f32.mrb[0].mxu1 }
 0x1d9   :  { %v212_v39 = vadd.f32 %v263_v36, %v211_v38  ;;  %v327_v40 = vpop.f32.mrb[1].mxu1 }
 0x1db   :  { %v215_v41 = vmax.f32 %v212_v39, 0.0 }
 0x1dd   :  { %v219_v42 = vsel %vm218_vm2, %v215_v41, 0.0 }
 0x1de   :  { %220 = vadd.xlane.f32.xlu0 %v219_v42 }
 0x26b   :  { %v221_v43 = vpop.xlane.xlu0 %220 }
 0x26c   :  { %v222_v44 = vmul.f32 0.03125, %v221_v43 }
 0x26e   :  { %v223_v45 = vsub.f32 %v215_v41, %v222_v44 }
 0x270   :  { %v224_v46 = vsel %vm218_vm2, %v223_v45, 0.0 }
 0x271   :  { %v225_v47 = vmul.f32 %v224_v46, %v224_v46 }
 0x273   :  { %226 = vadd.xlane.f32.xlu0 %v225_v47 }
 0x300   :  { %v227_v48 = vpop.xlane.xlu0 %226 }
 0x301   :  { %v228_v49 = vmul.f32 0.03125, %v227_v48 }
 0x303   :  { %v229_v50 = vadd.f32 1e-05, %v228_v49 }
 0x305   :  { %363 = vrsqrt.f32 %v229_v50 }
 0x30f   :  { %v364_v51 = vpop.eup %363 }
 0x310   :  { %v231_v53 = vmul.f32 %v364_v51, %v224_v46 }
 0x312   :  { %v237_v55 = vmul.f32 %v264_v52, %v231_v53 }
 0x314   :  { %v243_v56 = vadd.f32 %v265_v54, %v237_v55 }
 0x316   :  { %244 = vst [vmem:[#allocation7] sm:$0xff] %v243_v56 }
 0x317   :  { %420 = shalt.err (!%p417_p6)
}
 0x318   :  { %s421_s22 = scalar_lea.hbm %s523_s3, 128 }
 0x319   :  { %p422_p7 = scmp.ne.s32.totalorder %s523_s3, %s421_s22  ;;  %p425_p8 = scmp.lt.u32.totalorder %s421_s22, %s523_s3 }
 0x31b   :  { %p427_p9 = pnand %p425_p8, %p422_p7 }
 0x31d   :  { %430 = shalt.err (!%p427_p9)
}
 0x31e   :  { %254 = dma.vmem_to_hbm [thread:$0]  %s252_s18, 128, %s523_s3, [#allocation4]  }
 0x31f   :  { %435 = dma.done.wait [#allocation4], 128  }
 0x320   :  { %436 = vsyncadd [#allocation4], 4294967168 }
 0x321   :  { %258 = vsyncpa [#allocation3], 1 }
 0x322   :  { %259 = vsyncpa [#allocation6], 1 }
 0x323   :  { %260 = vsyncpa [#allocation4], 1 }

</bundles_post_ra>
